<compile_context>
chip_gen: v7x
topology: tpu7x:2x2x1
jax: 0.10.0
libtpu: 0.0.40
codegen_flags: <defaults>
</compile_context>

<pallas_src>
import jax
import jax.numpy as jnp
from jax.experimental import pallas as pl
from jax.experimental.pallas import tpu as pltpu

BN_EPS = 1e-5


def _pick_lane_tile(hw, max_tile):
    """Largest multiple-of-128 divisor of hw that is <= max_tile (requires hw % 128 == 0)."""
    best = 128
    t = 128
    while t <= min(hw, max_tile):
        if hw % t == 0:
            best = t
        t += 128
    return best


def _gated_conv_stats_kernel(s_ref, w1_ref, b1_ref, w2t_ref, x_ref,
                             y_ref, stats_ref, w2g_ref):
    """Pass 1: SE gate + gated 1x1 conv (192->32) + per-channel sum / sumsq accumulation.

    s_ref    : [N, 8]            squeeze input (x50 with 1x1 spatial dims dropped)
    w1_ref   : [8, 192]          conv2d17 weight (transposed), b1_ref: [1, 192] bias
    w2t_ref  : [32, 192]         conv2d18 weight, transposed (out-ch x in-ch), f32
    x_ref    : [1, 192, T_HW]    x47 block (NCHW, spatially flattened, producer dtype)
    y_ref    : [1, 32, T_HW]     un-normalized conv output block (f32)
    stats_ref: [1, 32, 2]        per-sample [sum, sumsq] accumulator (resident over t)
    w2g_ref  : [32, 192] scratch gate-folded weights, cached per sample (x dtype)
    """
    n = pl.program_id(0)   # batch index ("parallel")
    t = pl.program_id(1)   # spatial tile index (reduction axis for stats, "arbitrary")

    @pl.when(t == 0)
    def _():
        stats_ref[...] = jnp.zeros_like(stats_ref)
        # conv2d17 (1x1 conv on 1x1 spatial == tiny matmul) + sigmoid -> gate [1, 192]
        s_row = s_ref[pl.ds(n, 1), :]                                        # [1, 8]
        gate = jax.nn.sigmoid(
            jnp.dot(s_row, w1_ref[...], preferred_element_type=jnp.float32)
            + b1_ref[...])                                                   # [1, 192]
        # Fold gate into conv2d18 weights: sum_c x*g_c*w2[c,k] == sum_c x*(g_c*w2[c,k]).
        w2g_ref[...] = (w2t_ref[...] * gate).astype(w2g_ref.dtype)           # [32, 192]

    # conv2d18 as one 2-D MXU matmul, spatial dim on the lane axis (lane-dense output).
    y = jnp.dot(w2g_ref[...], x_ref[0], preferred_element_type=jnp.float32)  # [32, T_HW]
    y_ref[0] = y.astype(y_ref.dtype)

    # Per-channel batch statistics (channel stays on the sublane axis), merged output.
    psum = jnp.sum(y, axis=1, keepdims=True)                                 # [32, 1]
    psq = jnp.sum(y * y, axis=1, keepdims=True)                              # [32, 1]
    col = jax.lax.broadcasted_iota(jnp.int32, (psum.shape[0], 2), 1)
    stats_ref[0] += jnp.where(col == 0, psum, psq)                           # [32, 2]


def _bn_apply_kernel(scale_ref, shift_ref, y_ref, o_ref):
    """Pass 2 (in place via aliasing): o = y * scale + shift  (BatchNorm as one FMA).

    scale_ref/shift_ref : [32, 1]   broadcast along the lane (spatial) axis
    y_ref/o_ref         : [1, 32, T_HW]
    """
    o_ref[0] = (y_ref[0].astype(jnp.float32) * scale_ref[...] + shift_ref[...]
                ).astype(o_ref.dtype)


def se_conv_bn(x50, x47, w1, b1, w2, gamma, beta, eps=BN_EPS, max_hw_tile=8192):
    """x50: [N, 8, 1, 1], x47: [N, 192, H, W] (NCHW). Returns [N, 32, H, W] (float32).

    w1: [8, 192]   (conv2d17 weight, transposed for matmul form), b1: [192]
    w2: [192, 32]  (conv2d18 weight, transposed for matmul form)
    gamma/beta: [32]  BatchNorm affine parameters.
    """
    N, C_in, H, W = x47.shape
    C_sq = x50.shape[1]
    C_out = w2.shape[1]
    HW = H * W
    itemsize = jnp.dtype(x47.dtype).itemsize

    # Keep x47 at its producer dtype (bf16 streams at half the bandwidth); reshape is free.
    x = x47.reshape(N, C_in, HW)
    if HW % 128 == 0:
        hw_pad = HW
    elif C_in * HW * itemsize <= (6 << 20):
        hw_pad = HW                                   # single full-extent spatial block
    else:
        hw_pad = -(-HW // 128) * 128                  # pad to lane grain (extra x copy)
        x = jnp.pad(x, ((0, 0), (0, 0), (0, hw_pad - HW)))

    if hw_pad % 128 == 0:
        t_hw = _pick_lane_tile(hw_pad, max_hw_tile)   # pass-1 spatial tile
        t_hw2 = _pick_lane_tile(hw_pad, 16384)        # pass-2 (pure-bandwidth) tile
    else:
        t_hw = hw_pad
        t_hw2 = hw_pad

    s = x50.reshape(N, C_sq).astype(jnp.float32)      # [N, 8]   (tiny)
    w1f = w1.astype(jnp.float32)                      # [8, 192]
    b1_2d = b1.reshape(1, C_in).astype(jnp.float32)   # [1, 192]
    w2t = w2.T.astype(jnp.float32)                    # [32, 192]

    n_t = hw_pad // t_hw
    grid = (N, n_t)
    const2 = lambda n, t: (0, 0)

    # ---------------- pass 1: gated conv + per-channel stats ----------------
    y, stats = pl.pallas_call(
        _gated_conv_stats_kernel,
        grid=grid,
        in_specs=[
            pl.BlockSpec((N, C_sq), const2),                              # s
            pl.BlockSpec((C_sq, C_in), const2),                           # w1
            pl.BlockSpec((1, C_in), const2),                              # b1
            pl.BlockSpec((C_out, C_in), const2),                          # w2t
            pl.BlockSpec((1, C_in, t_hw), lambda n, t: (n, 0, t)),        # x
        ],
        out_specs=(
            pl.BlockSpec((1, C_out, t_hw), lambda n, t: (n, 0, t)),       # y
            pl.BlockSpec((1, C_out, 2), lambda n, t: (n, 0, 0)),          # [sum, sumsq]
        ),
        out_shape=(
            jax.ShapeDtypeStruct((N, C_out, hw_pad), jnp.float32),
            jax.ShapeDtypeStruct((N, C_out, 2), jnp.float32),
        ),
        scratch_shapes=[pltpu.VMEM((C_out, C_in), x.dtype)],              # cached w2*gate
        compiler_params=pltpu.CompilerParams(
            dimension_semantics=("parallel", "arbitrary"),
            vmem_limit_bytes=32 * 1024 * 1024,
        ),
    )(s, w1f, b1_2d, w2t, x)

    # ------------- finalize BN batch statistics (32 scalars, plain JAX) -------------
    # NOTE: biased variance via E[y^2] - E[y]^2 in f32 (clamped at 0); matches training BN.
    count = jnp.float32(N * HW)
    stats_all = jnp.sum(stats, axis=0)                         # [32, 2]
    mean = stats_all[:, 0] / count
    var = jnp.maximum(stats_all[:, 1] / count - mean * mean, 0.0)
    inv_std = jax.lax.rsqrt(var + eps)
    g32 = gamma.astype(jnp.float32)
    scale = (g32 * inv_std).reshape(C_out, 1)
    shift = (beta.astype(jnp.float32) - mean * g32 * inv_std).reshape(C_out, 1)

    # ---------------- pass 2: apply normalization in place (one FMA) ----------------
    n_t2 = hw_pad // t_hw2
    out = pl.pallas_call(
        _bn_apply_kernel,
        grid=(N, n_t2),
        in_specs=[
            pl.BlockSpec((C_out, 1), const2),                             # scale
            pl.BlockSpec((C_out, 1), const2),                             # shift
            pl.BlockSpec((1, C_out, t_hw2), lambda n, t: (n, 0, t)),      # y
        ],
        out_specs=pl.BlockSpec((1, C_out, t_hw2), lambda n, t: (n, 0, t)),
        out_shape=jax.ShapeDtypeStruct((N, C_out, hw_pad), jnp.float32),
        input_output_aliases={2: 0},                                      # in-place on y
        compiler_params=pltpu.CompilerParams(
            dimension_semantics=("parallel", "parallel"),
            vmem_limit_bytes=32 * 1024 * 1024,
        ),
    )(scale, shift, y)

    if hw_pad != HW:
        out = out[:, :, :HW]
    return out.reshape(N, C_out, H, W)


def reference(x50, x47, w1, b1, w2, gamma, beta, eps=BN_EPS):
    """Pure-JAX reference mirroring the PyTorch forward (training-mode BN)."""
    s = x50[:, :, 0, 0]
    g = jax.nn.sigmoid(s @ w1 + b1)                               # [N, 192]
    x53 = x47 * g[:, :, None, None]
    y = jnp.einsum("nchw,ck->nkhw", x53, w2)
    mean = y.mean(axis=(0, 2, 3), keepdims=True)
    var = ((y - mean) ** 2).mean(axis=(0, 2, 3), keepdims=True)
    return (y - mean) * jax.lax.rsqrt(var + eps) * gamma[None, :, None, None] \
        + beta[None, :, None, None]


if __name__ == "__main__":
    # Channel sizes fixed by the module (8 -> 192 -> 32); small batch/spatial for the test.
    N, C_SQ, C_IN, C_OUT = 2, 8, 192, 32

    key = jax.random.PRNGKey(0)
    k1, k2, k3, k4, k5 = jax.random.split(key, 5)

    w1 = jax.random.normal(k3, (C_SQ, C_IN), dtype=jnp.float32) * (1.0 / jnp.sqrt(C_SQ))
    b1 = jax.random.normal(k4, (C_IN,), dtype=jnp.float32) * 0.1
    w2 = jax.random.normal(k5, (C_IN, C_OUT), dtype=jnp.float32) * (1.0 / jnp.sqrt(C_IN))
    gamma = jnp.ones((C_OUT,), dtype=jnp.float32)
    beta = jnp.zeros((C_OUT,), dtype=jnp.float32)

    fn = jax.jit(se_conv_bn)

    # Case 1: lane-aligned spatial extent (tiled path).
    H, W = 16, 16
    x50 = jax.random.normal(k1, (N, C_SQ, 1, 1), dtype=jnp.float32)
    x47 = jax.random.normal(k2, (N, C_IN, H, W), dtype=jnp.float32)
    out = jax.block_until_ready(fn(x50, x47, w1, b1, w2, gamma, beta))
    ref = reference(x50, x47, w1, b1, w2, gamma, beta)
    assert out.shape == (N, C_OUT, H, W), out.shape
    assert jnp.allclose(out, ref, atol=1e-4, rtol=1e-4), float(jnp.max(jnp.abs(out - ref)))

    # Case 2: non-128-aligned spatial extent (full-extent block fallback path).
    H2, W2 = 6, 6
    x47b = jax.random.normal(k2, (N, C_IN, H2, W2), dtype=jnp.float32)
    out2 = jax.block_until_ready(fn(x50, x47b, w1, b1, w2, gamma, beta))
    ref2 = reference(x50, x47b, w1, b1, w2, gamma, beta)
    assert out2.shape == (N, C_OUT, H2, W2), out2.shape
    assert jnp.allclose(out2, ref2, atol=1e-4, rtol=1e-4), float(jnp.max(jnp.abs(out2 - ref2)))

    print("KERNEL_OK")
</pallas_src>

<mosaic_0001>
module attributes {stable_mosaic.version = 11 : i64} {
  func.func @_gated_conv_stats_kernel(%arg0: i32, %arg1: i32, %arg2: memref<2x8xf32, #tpu.memory_space<vmem>>, %arg3: memref<8x192xf32, #tpu.memory_space<vmem>>, %arg4: memref<1x192xf32, #tpu.memory_space<vmem>>, %arg5: memref<32x192xf32, #tpu.memory_space<vmem>>, %arg6: memref<1x192x256xf32, #tpu.memory_space<vmem>>, %arg7: memref<1x32x256xf32, #tpu.memory_space<vmem>>, %arg8: memref<1x32x2xf32, #tpu.memory_space<vmem>>, %arg9: memref<32x192xf32, #tpu.memory_space<vmem>>) attributes {dimension_semantics = [#tpu.dimension_semantics<parallel>, #tpu.dimension_semantics<arbitrary>], iteration_bounds = array<i64: 2, 1>, scalar_prefetch = 0 : i64, scratch_operands = 1 : i64, tpu.core_type = #tpu.core_type<tc>, window_params = [{pipeline_mode = #tpu.pipeline_mode<synchronous>, transform_indices = @transform_0, window_bounds = array<i64: 2, 8>}, {pipeline_mode = #tpu.pipeline_mode<synchronous>, transform_indices = @transform_1, window_bounds = array<i64: 8, 192>}, {pipeline_mode = #tpu.pipeline_mode<synchronous>, transform_indices = @transform_2, window_bounds = array<i64: 1, 192>}, {pipeline_mode = #tpu.pipeline_mode<synchronous>, transform_indices = @transform_3, window_bounds = array<i64: 32, 192>}, {transform_indices = @transform_4, window_bounds = array<i64: 1, 192, 256>}, {transform_indices = @transform_5, window_bounds = array<i64: 1, 32, 256>}, {transform_indices = @transform_6, window_bounds = array<i64: 1, 32, 2>}]} {
    %c0_i32 = arith.constant 0 : i32
    %0 = arith.cmpi eq, %arg1, %c0_i32 : i32
    %1 = arith.extui %0 : i1 to i32
    %c0_i32_0 = arith.constant 0 : i32
    %2 = arith.cmpi ne, %1, %c0_i32_0 : i32
    scf.if %2 {
      %cst_17 = arith.constant 0.000000e+00 : f32
      %29 = vector.broadcast %cst_17 : f32 to vector<1x32x2xf32>
      %c0_18 = arith.constant 0 : index
      %c0_19 = arith.constant 0 : index
      %c0_20 = arith.constant 0 : index
      %30 = vector.load %arg8[%c0_18, %c0_19, %c0_20] : memref<1x32x2xf32, #tpu.memory_space<vmem>>, vector<1x32x2xf32>
      tpu.vector_store %arg8[%c0_18, %c0_19, %c0_20], %29 {strides = array<i32>} : memref<1x32x2xf32, #tpu.memory_space<vmem>>, vector<1x32x2xf32>,
      %31 = arith.index_cast %arg0 : i32 to index
      %c0_21 = arith.constant 0 : index
      %32 = vector.load %arg2[%31, %c0_21] : memref<2x8xf32, #tpu.memory_space<vmem>>, vector<1x8xf32>
      %c0_22 = arith.constant 0 : index
      %c0_23 = arith.constant 0 : index
      %33 = vector.load %arg3[%c0_22, %c0_23] : memref<8x192xf32, #tpu.memory_space<vmem>>, vector<8x192xf32>
      %cst_24 = arith.constant dense<0.000000e+00> : vector<1x192xf32>
      %34 = tpu.matmul %32, %33, %cst_24 {dimension_numbers = #tpu.dot_dimension_numbers<[1], [0], [0], [1], [0, 0, 1, 1], [], []>} : vector<1x8xf32>, vector<8x192xf32>, vector<1x192xf32> -> vector<1x192xf32>
      %c0_25 = arith.constant 0 : index
      %c0_26 = arith.constant 0 : index
      %35 = vector.load %arg4[%c0_25, %c0_26] : memref<1x192xf32, #tpu.memory_space<vmem>>, vector<1x192xf32>
      %36 = arith.addf %34, %35 : vector<1x192xf32>
      %37 = arith.negf %36 : vector<1x192xf32>
      %38 = math.exp %37 : vector<1x192xf32>
      %cst_27 = arith.constant 1.000000e+00 : f32
      %39 = vector.broadcast %cst_27 : f32 to vector<1x192xf32>
      %40 = arith.addf %39, %38 : vector<1x192xf32>
      %41 = arith.divf %39, %40 : vector<1x192xf32>
      %c0_28 = arith.constant 0 : index
      %c0_29 = arith.constant 0 : index
      %42 = vector.load %arg5[%c0_28, %c0_29] : memref<32x192xf32, #tpu.memory_space<vmem>>, vector<32x192xf32>
      %43 = vector.broadcast %41 : vector<1x192xf32> to vector<32x192xf32>
      %44 = arith.mulf %42, %43 : vector<32x192xf32>
      %c0_30 = arith.constant 0 : index
      %c0_31 = arith.constant 0 : index
      %45 = vector.load %arg9[%c0_30, %c0_31] : memref<32x192xf32, #tpu.memory_space<vmem>>, vector<32x192xf32>
      tpu.vector_store %arg9[%c0_30, %c0_31], %44 {strides = array<i32>} : memref<32x192xf32, #tpu.memory_space<vmem>>, vector<32x192xf32>,
    } else {
    }
    %c0 = arith.constant 0 : index
    %c0_1 = arith.constant 0 : index
    %3 = vector.load %arg9[%c0, %c0_1] : memref<32x192xf32, #tpu.memory_space<vmem>>, vector<32x192xf32>
    %c0_2 = arith.constant 0 : index
    %c0_3 = arith.constant 0 : index
    %c0_4 = arith.constant 0 : index
    %4 = vector.load %arg6[%c0_2, %c0_3, %c0_4] : memref<1x192x256xf32, #tpu.memory_space<vmem>>, vector<1x192x256xf32>
    %5 = vector.shape_cast %4 : vector<1x192x256xf32> to vector<192x256xf32>
    %cst = arith.constant dense<0.000000e+00> : vector<32x256xf32>
    %6 = tpu.matmul %3, %5, %cst {dimension_numbers = #tpu.dot_dimension_numbers<[1], [0], [0], [1], [0, 0, 1, 1], [], []>} : vector<32x192xf32>, vector<192x256xf32>, vector<32x256xf32> -> vector<32x256xf32>
    %c0_5 = arith.constant 0 : index
    %c0_6 = arith.constant 0 : index
    %c0_7 = arith.constant 0 : index
    %7 = vector.load %arg7[%c0_5, %c0_6, %c0_7] : memref<1x32x256xf32, #tpu.memory_space<vmem>>, vector<1x32x256xf32>
    %8 = vector.shape_cast %7 : vector<1x32x256xf32> to vector<32x256xf32>
    %9 = vector.shape_cast %6 : vector<32x256xf32> to vector<1x32x256xf32>
    tpu.vector_store %arg7[%c0_5, %c0_6, %c0_7], %9 {strides = array<i32>} : memref<1x32x256xf32, #tpu.memory_space<vmem>>, vector<1x32x256xf32>,
    %cst_8 = arith.constant dense<0.000000e+00> : vector<32xf32>
    %10 = vector.multi_reduction <add>, %6, %cst_8 [1] : vector<32x256xf32> to vector<32xf32>
    %11 = vector.shape_cast %10 : vector<32xf32> to vector<32x1xf32>
    %12 = arith.mulf %6, %6 : vector<32x256xf32>
    %cst_9 = arith.constant dense<0.000000e+00> : vector<32xf32>
    %13 = vector.multi_reduction <add>, %12, %cst_9 [1] : vector<32x256xf32> to vector<32xf32>
    %14 = vector.shape_cast %13 : vector<32xf32> to vector<32x1xf32>
    %15 = tpu.iota {dimensions = array<i32: 1>} : vector<32x2xi32>
    %c0_10 = arith.constant 0 : index
    %c0_11 = arith.constant 0 : index
    %c0_12 = arith.constant 0 : index
    %16 = vector.load %arg8[%c0_10, %c0_11, %c0_12] : memref<1x32x2xf32, #tpu.memory_space<vmem>>, vector<1x32x2xf32>
    %17 = vector.shape_cast %16 : vector<1x32x2xf32> to vector<32x2xf32>
    %c0_i32_13 = arith.constant 0 : i32
    %18 = vector.broadcast %c0_i32_13 : i32 to vector<32x2xi32>
    %19 = arith.cmpi eq, %15, %18 : vector<32x2xi32>
    %20 = vector.shape_cast %11 : vector<32x1xf32> to vector<32x1xf32>
    %21 = vector.broadcast %20 : vector<32x1xf32> to vector<32x2xf32>
    %22 = vector.shape_cast %14 : vector<32x1xf32> to vector<32x1xf32>
    %23 = vector.broadcast %22 : vector<32x1xf32> to vector<32x2xf32>
    %24 = arith.select %19, %21, %23 : vector<32x2xi1>, vector<32x2xf32>
    %25 = arith.addf %17, %24 : vector<32x2xf32>
    %c0_14 = arith.constant 0 : index
    %c0_15 = arith.constant 0 : index
    %c0_16 = arith.constant 0 : index
    %26 = vector.load %arg8[%c0_14, %c0_15, %c0_16] : memref<1x32x2xf32, #tpu.memory_space<vmem>>, vector<1x32x2xf32>
    %27 = vector.shape_cast %26 : vector<1x32x2xf32> to vector<32x2xf32>
    %28 = vector.shape_cast %25 : vector<32x2xf32> to vector<1x32x2xf32>
    tpu.vector_store %arg8[%c0_14, %c0_15, %c0_16], %28 {strides = array<i32>} : memref<1x32x2xf32, #tpu.memory_space<vmem>>, vector<1x32x2xf32>,
    return
  }
  func.func @transform_0(%arg0: i32, %arg1: i32) -> (i32, i32) {
    %c0_i32 = arith.constant 0 : i32
    %c0_i32_0 = arith.constant 0 : i32
    %c0_i32_1 = arith.constant 0 : i32
    return %c0_i32, %c0_i32_0 : i32, i32
  }
  func.func @transform_1(%arg0: i32, %arg1: i32) -> (i32, i32) {
    %c0_i32 = arith.constant 0 : i32
    %c0_i32_0 = arith.constant 0 : i32
    %c0_i32_1 = arith.constant 0 : i32
    return %c0_i32, %c0_i32_0 : i32, i32
  }
  func.func @transform_2(%arg0: i32, %arg1: i32) -> (i32, i32) {
    %c0_i32 = arith.constant 0 : i32
    %c0_i32_0 = arith.constant 0 : i32
    %c0_i32_1 = arith.constant 0 : i32
    return %c0_i32, %c0_i32_0 : i32, i32
  }
  func.func @transform_3(%arg0: i32, %arg1: i32) -> (i32, i32) {
    %c0_i32 = arith.constant 0 : i32
    %c0_i32_0 = arith.constant 0 : i32
    %c0_i32_1 = arith.constant 0 : i32
    return %c0_i32, %c0_i32_0 : i32, i32
  }
  func.func @transform_4(%arg0: i32, %arg1: i32) -> (i32, i32, i32) {
    %c0_i32 = arith.constant 0 : i32
    %c0_i32_0 = arith.constant 0 : i32
    return %arg0, %c0_i32, %arg1 : i32, i32, i32
  }
  func.func @transform_5(%arg0: i32, %arg1: i32) -> (i32, i32, i32) {
    %c0_i32 = arith.constant 0 : i32
    %c0_i32_0 = arith.constant 0 : i32
    return %arg0, %c0_i32, %arg1 : i32, i32, i32
  }
  func.func @transform_6(%arg0: i32, %arg1: i32) -> (i32, i32, i32) {
    %c0_i32 = arith.constant 0 : i32
    %c0_i32_0 = arith.constant 0 : i32
    %c0_i32_1 = arith.constant 0 : i32
    return %arg0, %c0_i32, %c0_i32_0 : i32, i32, i32
  }
}

module attributes {stable_mosaic.version = 11 : i64} {
  func.func @_bn_apply_kernel(%arg0: i32, %arg1: i32, %arg2: memref<32x1xf32, #tpu.memory_space<vmem>>, %arg3: memref<32x1xf32, #tpu.memory_space<vmem>>, %arg4: memref<1x32x256xf32, #tpu.memory_space<vmem>>, %arg5: memref<1x32x256xf32, #tpu.memory_space<vmem>>) attributes {dimension_semantics = [#tpu.dimension_semantics<parallel>, #tpu.dimension_semantics<parallel>], iteration_bounds = array<i64: 2, 1>, scalar_prefetch = 0 : i64, scratch_operands = 0 : i64, tpu.core_type = #tpu.core_type<tc>, window_params = [{pipeline_mode = #tpu.pipeline_mode<synchronous>, transform_indices = @transform_0, window_bounds = array<i64: 32, 1>}, {pipeline_mode = #tpu.pipeline_mode<synchronous>, transform_indices = @transform_1, window_bounds = array<i64: 32, 1>}, {transform_indices = @transform_2, window_bounds = array<i64: 1, 32, 256>}, {transform_indices = @transform_3, window_bounds = array<i64: 1, 32, 256>}]} {
    %c0 = arith.constant 0 : index
    %c0_0 = arith.constant 0 : index
    %c0_1 = arith.constant 0 : index
    %0 = vector.load %arg4[%c0, %c0_0, %c0_1] : memref<1x32x256xf32, #tpu.memory_space<vmem>>, vector<1x32x256xf32>
    %1 = vector.shape_cast %0 : vector<1x32x256xf32> to vector<32x256xf32>
    %c0_2 = arith.constant 0 : index
    %c0_3 = arith.constant 0 : index
    %2 = vector.load %arg2[%c0_2, %c0_3] : memref<32x1xf32, #tpu.memory_space<vmem>>, vector<32x1xf32>
    %3 = vector.broadcast %2 : vector<32x1xf32> to vector<32x256xf32>
    %4 = arith.mulf %1, %3 : vector<32x256xf32>
    %c0_4 = arith.constant 0 : index
    %c0_5 = arith.constant 0 : index
    %5 = vector.load %arg3[%c0_4, %c0_5] : memref<32x1xf32, #tpu.memory_space<vmem>>, vector<32x1xf32>
    %6 = vector.broadcast %5 : vector<32x1xf32> to vector<32x256xf32>
    %7 = arith.addf %4, %6 : vector<32x256xf32>
    %c0_6 = arith.constant 0 : index
    %c0_7 = arith.constant 0 : index
    %c0_8 = arith.constant 0 : index
    %8 = vector.load %arg5[%c0_6, %c0_7, %c0_8] : memref<1x32x256xf32, #tpu.memory_space<vmem>>, vector<1x32x256xf32>
    %9 = vector.shape_cast %8 : vector<1x32x256xf32> to vector<32x256xf32>
    %10 = vector.shape_cast %7 : vector<32x256xf32> to vector<1x32x256xf32>
    tpu.vector_store %arg5[%c0_6, %c0_7, %c0_8], %10 {strides = array<i32>} : memref<1x32x256xf32, #tpu.memory_space<vmem>>, vector<1x32x256xf32>,
    return
  }
  func.func @transform_0(%arg0: i32, %arg1: i32) -> (i32, i32) {
    %c0_i32 = arith.constant 0 : i32
    %c0_i32_0 = arith.constant 0 : i32
    %c0_i32_1 = arith.constant 0 : i32
    return %c0_i32, %c0_i32_0 : i32, i32
  }
  func.func @transform_1(%arg0: i32, %arg1: i32) -> (i32, i32) {
    %c0_i32 = arith.constant 0 : i32
    %c0_i32_0 = arith.constant 0 : i32
    %c0_i32_1 = arith.constant 0 : i32
    return %c0_i32, %c0_i32_0 : i32, i32
  }
  func.func @transform_2(%arg0: i32, %arg1: i32) -> (i32, i32, i32) {
    %c0_i32 = arith.constant 0 : i32
    %c0_i32_0 = arith.constant 0 : i32
    return %arg0, %c0_i32, %arg1 : i32, i32, i32
  }
  func.func @transform_3(%arg0: i32, %arg1: i32) -> (i32, i32, i32) {
    %c0_i32 = arith.constant 0 : i32
    %c0_i32_0 = arith.constant 0 : i32
    return %arg0, %c0_i32, %arg1 : i32, i32, i32
  }
}

</mosaic_0001>

<bundles_post_ra>
// kernel: se_conv_bn.3
= control target key start
LH: loop header
LB: loop body
LE: loop exit
PB: predicated region body
PF: predicated region fallthrough
CT: control target
= control target key end

     0   :  { %s462_s12 = smov 0   ;;  %s464_s13 = smov 0   ;;  %s523_s0 = inlined_call_operand.vmem [shape: f32[32,1], index: 0, kind: input, shape index: {}]   ;;  %s524_s1 = inlined_call_operand.vmem [shape: f32[32,1], index: 1, kind: input, shape index: {}]   ;;  %s525_s2 = inlined_call_operand.vmem [shape: f32[2,32,256], index: 2, kind: input, shape index: {}, may-alias: {2,3}]   ;;  %s526_s3 = inlined_call_operand.vmem [shape: f32[2,32,256], index: 3, kind: output, shape index: {}, may-alias: {2,3}]  }
   0x1   :  { %s466_s14 = smov 0  }
   0x2 LB: > { %s25_s15 = sadd.s32 1, %s435_s13  ;;  %p381_p0 = scmp.ge.s32.totalorder %s439_s14, 1  ;;  %s439_s14 = sphi %s466_s14, %s13_s14   ;;  %s435_s13 = sphi %s464_s13, %s528_s13   ;;  %s431_s12 = sphi %s462_s12, %s527_s12  }
   0x3   : > { %p27_p1 = scmp.ge.s32.totalorder %s25_s15, 2  ;;  %p158_p2 = scmp.lt.s32.totalorder %s439_s14, 3 }
   0x5   : > { %s530_s15 = smov (%p27_p1, %s25_s15), 0  ;;  %p159_p3 = pnand %p381_p0, %p158_p2 }
   0x6   : > { %v220_v0 = vld [vmem:[%s523_s0 + $0x10] sm:$0xff] (!%p159_p3)  ;;  %v218_v1 = vld [vmem:[%s523_s0] sm:$0xff] (!%p159_p3)  ;;  %v441_v2 = vmov (!%p159_p3), 0   ;;  %v221_v3 = vld [vmem:[%s523_s0 + $0x18] sm:$0xff] (!%p159_p3)  ;;  %p191_p4 = scmp.lt.s32.totalorder (!%p159_p3), %s431_s12, 1 }
   0x7   : > { %162 = sbr.rel (%p159_p3) target bundleno = 152 (0x98), region = 32  ;;  %416 = vset.pattern.permute.xlu1 (!%p159_p3), %v441_v2  ;;  %415 = vset.pattern.permute.xlu0 (!%p159_p3), %v441_v2  ;;  %v219_v4 = vld [vmem:[%s523_s0 + $0x8] sm:$0xff] (!%p159_p3)  ;;  %v250_v6 = vld [vmem:[%s524_s1] sm:$0xff] (!%p159_p3)  ;;  %v253_v7 = vld [vmem:[%s524_s1 + $0x18] sm:$0xff] (!%p159_p3) }
   0x8   : > { %234 = vperm.xlu1 (!%p159_p3), %416, %v220_v0   ;;  %224 = vperm.xlu0 (!%p159_p3), %415, %v218_v1   ;;  %v251_v5 = vld [vmem:[%s524_s1 + $0x8] sm:$0xff] (!%p159_p3)  ;;  %v252_v8 = vld [vmem:[%s524_s1 + $0x10] sm:$0xff] (!%p159_p3) }
   0xc   : > { %239 = vperm.xlu1 (!%p159_p3), %416, %v221_v3   ;;  %229 = vperm.xlu0 (!%p159_p3), %415, %v219_v4  }
   0xe   : > { %s532_s12 = smov (!%p191_p4, %s431_s12), 1 }
   0xf   : > { %s388_s5 = sshll.u32 %s532_s12, 6 }
  0x10   : > { %261 = vperm.xlu1 %416, %v251_v5   ;;  %256 = vperm.xlu0 %415, %v250_v6   ;;  %s198_s8 = scalar_lea.vmem %s525_s2, %s388_s5  ;;  %s208_s11 = scalar_lea.vmem %s526_s3, %s388_s5 }
  0x11   : > { %v210_v11 = vld [vmem:[%s198_s8] sm:$0xff]  ;;  %v211_v12 = vld [vmem:[%s198_s8 + $0x8] sm:$0xff]  ;;  %v212_v15 = vld [vmem:[%s198_s8 + $0x10] sm:$0xff] }
  0x12   : > { %v213_v16 = vld [vmem:[%s198_s8 + $0x18] sm:$0xff]  ;;  %v214_v17 = vld [vmem:[%s198_s8 + $0x20] sm:$0xff]  ;;  %v215_v22 = vld [vmem:[%s198_s8 + $0x28] sm:$0xff] }
  0x13   : > { %v216_v23 = vld [vmem:[%s198_s8 + $0x30] sm:$0xff]  ;;  %v217_v24 = vld [vmem:[%s198_s8 + $0x38] sm:$0xff] }
  0x14   : > { %271 = vperm.xlu1 %416, %v253_v7   ;;  %266 = vperm.xlu0 %415, %v252_v8  }
  0x87   : > { %v235_v9 = vpop.permute.xlu1 %234  ;;  %v225_v10 = vpop.permute.xlu0 %224 }
  0x88   : > { %v242_v18 = vmul.f32 %v225_v10, %v210_v11  ;;  %v243_v19 = vmul.f32 %v225_v10, %v211_v12  ;;  %v246_v31 = vmul.f32 %v235_v9, %v214_v17  ;;  %v247_v32 = vmul.f32 %v235_v9, %v215_v22 }
  0x8b   : > { %v240_v13 = vpop.permute.xlu1 %239  ;;  %v230_v14 = vpop.permute.xlu0 %229 }
  0x8c   : > { %v244_v20 = vmul.f32 %v230_v14, %v212_v15  ;;  %v245_v21 = vmul.f32 %v230_v14, %v213_v16  ;;  %v248_v33 = vmul.f32 %v240_v13, %v216_v23  ;;  %v249_v34 = vmul.f32 %v240_v13, %v217_v24 }
  0x8f   : > { %v262_v25 = vpop.permute.xlu1 %261  ;;  %v257_v26 = vpop.permute.xlu0 %256 }
  0x90   : > { %v276_v27 = vadd.f32 %v262_v25, %v244_v20  ;;  %v277_v28 = vadd.f32 %v262_v25, %v245_v21  ;;  %v274_v29 = vadd.f32 %v257_v26, %v242_v18  ;;  %v275_v30 = vadd.f32 %v257_v26, %v243_v19 }
  0x92   : > { %284 = vst [vmem:[%s208_s11 + $0x10] sm:$0xff] %v276_v27  ;;  %285 = vst [vmem:[%s208_s11 + $0x18] sm:$0xff] %v277_v28 }
  0x93   : > { %282 = vst [vmem:[%s208_s11] sm:$0xff] %v274_v29  ;;  %283 = vst [vmem:[%s208_s11 + $0x8] sm:$0xff] %v275_v30  ;;  %v272_v35 = vpop.permute.xlu1 %271  ;;  %v267_v36 = vpop.permute.xlu0 %266 }
  0x94   : > { %v280_v37 = vadd.f32 %v272_v35, %v248_v33  ;;  %v281_v38 = vadd.f32 %v272_v35, %v249_v34  ;;  %v278_v39 = vadd.f32 %v267_v36, %v246_v31  ;;  %v279_v40 = vadd.f32 %v267_v36, %v247_v32 }
  0x96   : > { %288 = vst [vmem:[%s208_s11 + $0x30] sm:$0xff] %v280_v37  ;;  %289 = vst [vmem:[%s208_s11 + $0x38] sm:$0xff] %v281_v38 }
  0x97   : > { %286 = vst [vmem:[%s208_s11 + $0x20] sm:$0xff] %v278_v39  ;;  %287 = vst [vmem:[%s208_s11 + $0x28] sm:$0xff] %v279_v40 }
  0x98 PF: > { %s13_s14 = sadd.s32 1, %s439_s14   ;;  %s527_s12 = smov %s435_s13 }
  0x99   : > { %p10_p5 = scmp.ge.s32.totalorder %s13_s14, 4   ;;  %s528_s13 = smov %s530_s15 }
  0x9b   :  { %12 = sbr.rel (!%p10_p5) target bundleno = 2 (0x2), region = 62 }

// kernel: se_conv_bn.2
= control target key start
LH: loop header
LB: loop body
LE: loop exit
PB: predicated region body
PF: predicated region fallthrough
CT: control target
= control target key end

     0   :  { %s975_s21 = smov 0   ;;  %s977_s22 = smov 0   ;;  %s1148_s0 = inlined_call_operand.vmem [shape: f32[2,8], index: 0, kind: input, shape index: {}]   ;;  %s1149_s1 = inlined_call_operand.vmem [shape: f32[8,192], index: 1, kind: input, shape index: {}]   ;;  %s1150_s2 = inlined_call_operand.vmem [shape: f32[1,192], index: 2, kind: input, shape index: {}]   ;;  %s1151_s3 = inlined_call_operand.vmem [shape: f32[32,192], index: 3, kind: input, shape index: {}]   ;;  %s1152_s4 = inlined_call_operand.vmem [shape: f32[2,192,256], index: 4, kind: input, shape index: {}]   ;;  %s1153_s5 = inlined_call_operand.vmem [shape: f32[2,32,256], index: 5, kind: output, shape index: {0}]   ;;  %s1154_s6 = inlined_call_operand.vmem [shape: f32[2,32,2], index: 6, kind: output, shape index: {1}]  }
   0x1   :  { %s979_s23 = smov 0  }
   0x2 LB: > { %s29_s24 = sadd.s32 1, %s933_s22  ;;  %p792_p0 = scmp.ge.s32.totalorder %s937_s23, 1  ;;  %s937_s23 = sphi %s979_s23, %s17_s23   ;;  %s933_s22 = sphi %s977_s22, %s1156_s22   ;;  %s929_s21 = sphi %s975_s21, %s1155_s21  }
   0x3   : > { %p31_p1 = scmp.ge.s32.totalorder %s29_s24, 2  ;;  %p236_p2 = scmp.lt.s32.totalorder %s937_s23, 3 }
   0x5   : > { %s1158_s24 = smov (%p31_p1, %s29_s24), 0  ;;  %p237_p3 = pnand %p792_p0, %p236_p2 }
   0x6   : > { %v316_v0 = vld [vmem:[%s1149_s1 + $0x8] sm:$0xff] (!%p237_p3)  ;;  %v315_v1 = vld [vmem:[%s1149_s1] sm:$0xff] (!%p237_p3)  ;;  %p280_p4 = scmp.lt.s32.totalorder (!%p237_p3), %s929_s21, 1  ;;  %s313_s7 = scalar_lea.vmem (!%p237_p3), %s1148_s0, %s929_s21  ;;  %vm329_vm0 = vcmask (!%p237_p3), 64512   ;;  %v939_v2 = vmov (!%p237_p3), 0.0   ;;  %vm308_vm1 = vcmask (!%p237_p3), 15360  }
   0x7   : > { %240 = sbr.rel (%p237_p3) target bundleno = 638 (0x27e), region = 40  ;;  %333 = vmatprep.subr.mxu0 (!%p237_p3), %v316_v0  ;;  %397 = vmatprep.mubr.f32.mxu0 (!%p237_p3), %v939_v2  ;;  %v314_v3 = vld [vmem:[%s313_s7] sm:$0x1] (!%p237_p3)  ;;  %vm441_vm2 = vcmask (!%p237_p3), 523264  }
   0x8   : > { %334 = vmatpush1.msra.mxu0 (!%p237_p3), %v315_v1 }
   0x9   : > { %798 = vmatmul.mubr.msk.f32.vlgmr.msra.gmra.mrb[0].mxu0 (!%p237_p3), %vm329_vm0, %v314_v3 }
   0xe   : > { %s1160_s21 = smov (!%p280_p4, %s929_s21), 1 }
   0xf   : > { %s881_s8 = smul.u32 384, %s1160_s21  ;;  %s808_s9 = sshll.u32 %s1160_s21, 5 }
  0x10   : > { %s1009_s12 = scalar_lea.vmem %s1154_s6, %s808_s9 }
  0x11   : > { %s1014_s15 = scalar_lea.vmem %s1152_s4, %s881_s8  ;;  %309 = vst.msk [vmem:[%s1009_s12] sm:$0xff] %vm308_vm1, %v939_v2  ;;  %310 = vst.msk [vmem:[%s1009_s12 + $0x8] sm:$0xff] %vm308_vm1, %v939_v2 }
  0x12   : > { %311 = vst.msk [vmem:[%s1009_s12 + $0x10] sm:$0xff] %vm308_vm1, %v939_v2  ;;  %312 = vst.msk [vmem:[%s1009_s12 + $0x18] sm:$0xff] %vm308_vm1, %v939_v2  ;;  %v458_v4 = vld [vmem:[%s1014_s15 + $0x8] sm:$0xff]  ;;  %v460_v5 = vld [vmem:[%s1014_s15 + $0x18] sm:$0xff] }
  0x13   : > { %v457_v6 = vld [vmem:[%s1014_s15] sm:$0xff]  ;;  %v809_v7 = vpack.c.bf16 %v460_v5, %v458_v4  ;;  %v459_v8 = vld [vmem:[%s1014_s15 + $0x10] sm:$0xff]  ;;  %v462_v9 = vld [vmem:[%s1014_s15 + $0x28] sm:$0xff] }
  0x14   : > { %v464_v10 = vld [vmem:[%s1014_s15 + $0x38] sm:$0xff]  ;;  %v811_v11 = vpack.c.bf16 %v459_v8, %v457_v6  ;;  %v461_v13 = vld [vmem:[%s1014_s15 + $0x20] sm:$0xff]  ;;  %v463_v14 = vld [vmem:[%s1014_s15 + $0x30] sm:$0xff] }
  0x15   : > { %v813_v12 = vpack.c.bf16 %v464_v10, %v462_v9  ;;  %810 = vmatprep.subr.bf16.mxu0 %v809_v7  ;;  %857 = vmatprep.subr.bf16.mxu1 %v809_v7  ;;  %v815_v15 = vpack.c.bf16 %v463_v14, %v461_v13  ;;  %v466_v16 = vld [vmem:[%s1014_s15 + $0x48] sm:$0xff]  ;;  %v468_v17 = vld [vmem:[%s1014_s15 + $0x58] sm:$0xff]  ;;  %v465_v19 = vld [vmem:[%s1014_s15 + $0x40] sm:$0xff] }
  0x16   : > { %812 = vmatpush1.bf16.msra.mxu0 %v811_v11  ;;  %869 = vmatpush1.bf16.msra.mxu1 %v811_v11  ;;  %v817_v18 = vpack.c.bf16 %v468_v17, %v466_v16  ;;  %v467_v20 = vld [vmem:[%s1014_s15 + $0x50] sm:$0xff]  ;;  %v470_v22 = vld [vmem:[%s1014_s15 + $0x68] sm:$0xff]  ;;  %v472_v23 = vld [vmem:[%s1014_s15 + $0x78] sm:$0xff] }
  0x17   : > { %814 = vmatprep.subr.bf16.mxu0 %v813_v12  ;;  %858 = vmatprep.subr.bf16.mxu1 %v813_v12  ;;  %v819_v21 = vpack.c.bf16 %v467_v20, %v465_v19  ;;  %v821_v24 = vpack.c.bf16 %v472_v23, %v470_v22  ;;  %v469_v25 = vld [vmem:[%s1014_s15 + $0x60] sm:$0xff]  ;;  %v471_v26 = vld [vmem:[%s1014_s15 + $0x70] sm:$0xff]  ;;  %v474_v28 = vld [vmem:[%s1014_s15 + $0x88] sm:$0xff]  ;;  %v319_v12 = vlaneseq }
  0x18   : > { %v823_v27 = vpack.c.bf16 %v471_v26, %v469_v25  ;;  %v476_v29 = vld [vmem:[%s1014_s15 + $0x98] sm:$0xff]  ;;  %v473_v31 = vld [vmem:[%s1014_s15 + $0x80] sm:$0xff]  ;;  %v475_v32 = vld [vmem:[%s1014_s15 + $0x90] sm:$0xff] }
  0x19   : > { %v825_v30 = vpack.c.bf16 %v476_v29, %v474_v28  ;;  %v827_v33 = vpack.c.bf16 %v475_v32, %v473_v31  ;;  %v478_v34 = vld [vmem:[%s1014_s15 + $0xa8] sm:$0xff]  ;;  %v480_v35 = vld [vmem:[%s1014_s15 + $0xb8] sm:$0xff]  ;;  %v477_v37 = vld [vmem:[%s1014_s15 + $0xa0] sm:$0xff]  ;;  %v320_v13 = vshrl.u32 %v319_v12, 7 }
  0x1a   : > { %816 = vmatpush1.bf16.msra.mxu0 %v815_v15  ;;  %870 = vmatpush1.bf16.msra.mxu1 %v815_v15  ;;  %v829_v36 = vpack.c.bf16 %v480_v35, %v478_v34  ;;  %v479_v38 = vld [vmem:[%s1014_s15 + $0xb0] sm:$0xff]  ;;  %v482_v40 = vld [vmem:[%s1014_s15 + $0xc8] sm:$0xff]  ;;  %v484_v41 = vld [vmem:[%s1014_s15 + $0xd8] sm:$0xff] }
  0x1b   : > { %818 = vmatprep.subr.bf16.mxu0 %v817_v18  ;;  %859 = vmatprep.subr.bf16.mxu1 %v817_v18  ;;  %v831_v39 = vpack.c.bf16 %v479_v38, %v477_v37  ;;  %v833_v42 = vpack.c.bf16 %v484_v41, %v482_v40  ;;  %v481_v43 = vld [vmem:[%s1014_s15 + $0xc0] sm:$0xff]  ;;  %v483_v44 = vld [vmem:[%s1014_s15 + $0xd0] sm:$0xff]  ;;  %v486_v46 = vld [vmem:[%s1014_s15 + $0xe8] sm:$0xff]  ;;  %v321_v14 = vsub.s32 0, %v320_v13  ;;  %v325_v16 = vsub.s32 1, %v320_v13 }
  0x1c   : > { %v835_v45 = vpack.c.bf16 %v483_v44, %v481_v43  ;;  %v488_v47 = vld [vmem:[%s1014_s15 + $0xf8] sm:$0xff]  ;;  %v485_v49 = vld [vmem:[%s1014_s15 + $0xe0] sm:$0xff]  ;;  %v487_v50 = vld [vmem:[%s1014_s15 + $0xf0] sm:$0xff] }
  0x1d   : > { %v837_v48 = vpack.c.bf16 %v488_v47, %v486_v46  ;;  %v839_v51 = vpack.c.bf16 %v487_v50, %v485_v49  ;;  %v490_v52 = vld [vmem:[%s1014_s15 + $0x108] sm:$0xff]  ;;  %v492_v53 = vld [vmem:[%s1014_s15 + $0x118] sm:$0xff]  ;;  %v489_v55 = vld [vmem:[%s1014_s15 + $0x100] sm:$0xff] }
  0x1e   : > { %820 = vmatpush1.bf16.msra.mxu0 %v819_v21  ;;  %871 = vmatpush1.bf16.msra.mxu1 %v819_v21  ;;  %v841_v54 = vpack.c.bf16 %v492_v53, %v490_v52  ;;  %v491_v56 = vld [vmem:[%s1014_s15 + $0x110] sm:$0xff]  ;;  %v494_v58 = vld [vmem:[%s1014_s15 + $0x128] sm:$0xff]  ;;  %v496_v59 = vld [vmem:[%s1014_s15 + $0x138] sm:$0xff] }
  0x1f   : > { %822 = vmatprep.subr.bf16.mxu0 %v821_v24  ;;  %860 = vmatprep.subr.bf16.mxu1 %v821_v24  ;;  %v843_v57 = vpack.c.bf16 %v491_v56, %v489_v55  ;;  %v845_v60 = vpack.c.bf16 %v496_v59, %v494_v58  ;;  %v493_v61 = vld [vmem:[%s1014_s15 + $0x120] sm:$0xff]  ;;  %v495_v62 = vld [vmem:[%s1014_s15 + $0x130] sm:$0xff]  ;;  %v498_v0 = vld [vmem:[%s1014_s15 + $0x148] sm:$0xff] }
  0x20   : > { %v847_v63 = vpack.c.bf16 %v495_v62, %v493_v61  ;;  %v500_v1 = vld [vmem:[%s1014_s15 + $0x158] sm:$0xff]  ;;  %v497_v3 = vld [vmem:[%s1014_s15 + $0x140] sm:$0xff]  ;;  %v499_v4 = vld [vmem:[%s1014_s15 + $0x150] sm:$0xff] }
  0x21   : > { %v849_v2 = vpack.c.bf16 %v500_v1, %v498_v0  ;;  %v502_v5 = vld [vmem:[%s1014_s15 + $0x168] sm:$0xff]  ;;  %v851_v6 = vpack.c.bf16 %v499_v4, %v497_v3  ;;  %v504_v7 = vld [vmem:[%s1014_s15 + $0x178] sm:$0xff]  ;;  %v501_v8 = vld [vmem:[%s1014_s15 + $0x160] sm:$0xff] }
  0x22   : > { %824 = vmatpush1.bf16.msra.mxu0 %v823_v27  ;;  %872 = vmatpush1.bf16.msra.mxu1 %v823_v27  ;;  %v503_v9 = vld [vmem:[%s1014_s15 + $0x170] sm:$0xff]  ;;  %v853_v10 = vpack.c.bf16 %v504_v7, %v502_v5  ;;  %v317_v15 = vld [vmem:[%s1150_s2] sm:$0x3]  ;;  %v417_v34 = vld [vmem:[%s1151_s3 + $0x8] sm:$0xff]  ;;  %s807_s15 = sshll.u32 %s1160_s21, 6 }
  0x23   : > { %826 = vmatprep.subr.bf16.mxu0 %v825_v30  ;;  %861 = vmatprep.subr.bf16.mxu1 %v825_v30  ;;  %v855_v11 = vpack.c.bf16 %v503_v9, %v501_v8  ;;  %v322_v17 = vrot.slane %v317_v15, %v321_v14  ;;  %v326_v18 = vrot.slane %v317_v15, %v325_v16  ;;  %v416_v29 = vld [vmem:[%s1151_s3] sm:$0xff]  ;;  %v418_v30 = vld [vmem:[%s1151_s3 + $0x10] sm:$0xff]  ;;  %v419_v37 = vld [vmem:[%s1151_s3 + $0x18] sm:$0xff]  ;;  %s1112_s18 = scalar_lea.vmem %s1153_s5, %s807_s15 }
  0x24   : > { %v420_v32 = vld [vmem:[%s1151_s3 + $0x20] sm:$0xff]  ;;  %v421_v38 = vld [vmem:[%s1151_s3 + $0x28] sm:$0xff] }
  0x26   : > { %828 = vmatpush1.bf16.msra.mxu0 %v827_v33  ;;  %873 = vmatpush1.bf16.msra.mxu1 %v827_v33  ;;  %v422_v33 = vld [vmem:[%s1151_s3 + $0x30] sm:$0xff] }
  0x27   : > { %830 = vmatprep.subr.bf16.mxu0 %v829_v36  ;;  %862 = vmatprep.subr.bf16.mxu1 %v829_v36 }
  0x2a   : > { %832 = vmatpush1.bf16.msra.mxu0 %v831_v39  ;;  %874 = vmatpush1.bf16.msra.mxu1 %v831_v39  ;;  %v423_v39 = vld [vmem:[%s1151_s3 + $0x38] sm:$0xff] }
  0x2b   : > { %834 = vmatprep.subr.bf16.mxu0 %v833_v42  ;;  %863 = vmatprep.subr.bf16.mxu1 %v833_v42 }
  0x2e   : > { %836 = vmatpush1.bf16.msra.mxu0 %v835_v45  ;;  %875 = vmatpush1.bf16.msra.mxu1 %v835_v45 }
  0x2f   : > { %838 = vmatprep.subr.bf16.mxu0 %v837_v48  ;;  %864 = vmatprep.subr.bf16.mxu1 %v837_v48 }
  0x32   : > { %840 = vmatpush1.bf16.msra.mxu0 %v839_v51  ;;  %876 = vmatpush1.bf16.msra.mxu1 %v839_v51 }
  0x33   : > { %842 = vmatprep.subr.bf16.mxu0 %v841_v54  ;;  %865 = vmatprep.subr.bf16.mxu1 %v841_v54 }
  0x36   : > { %844 = vmatpush1.bf16.msra.mxu0 %v843_v57  ;;  %877 = vmatpush1.bf16.msra.mxu1 %v843_v57 }
  0x37   : > { %846 = vmatprep.subr.bf16.mxu0 %v845_v60  ;;  %866 = vmatprep.subr.bf16.mxu1 %v845_v60 }
  0x3a   : > { %848 = vmatpush1.bf16.msra.mxu0 %v847_v63  ;;  %878 = vmatpush1.bf16.msra.mxu1 %v847_v63 }
  0x3b   : > { %850 = vmatprep.subr.bf16.mxu0 %v849_v2  ;;  %867 = vmatprep.subr.bf16.mxu1 %v849_v2 }
  0x3e   : > { %852 = vmatpush1.bf16.msra.mxu0 %v851_v6  ;;  %879 = vmatpush1.bf16.msra.mxu1 %v851_v6 }
  0x3f   : > { %854 = vmatprep.subr.bf16.mxu0 %v853_v10  ;;  %868 = vmatprep.subr.bf16.mxu1 %v853_v10 }
  0x42   : > { %856 = vmatpush1.bf16.msra.mxu0 %v855_v11  ;;  %880 = vmatpush1.bf16.msra.mxu1 %v855_v11 }
  0xdc   : > { %v399_v19 = vpop.f32.mrb[0].mxu0 }
  0xdd   : > { %v400_v20 = vadd.f32 %v399_v19, %v322_v17  ;;  %v401_v21 = vpop.f32.mrb[1].mxu0  ;;  %v650_v17 = vld [vmem:[%s1009_s12 + $0x8] sm:$0xff] }
  0xde   : > { %v402_v22 = vadd.f32 %v401_v21, %v326_v18 }
  0xdf   : > { %v799_v23 = vmul.f32 -1.442695, %v400_v20 }
  0xe0   : > { %v800_v24 = vmul.f32 -1.442695, %v402_v22  ;;  %v649_v22 = vld [vmem:[%s1009_s12] sm:$0xff] }
  0xe1   : > { %907 = vpow2.f32 %v799_v23 }
  0xe2   : > { %909 = vpow2.f32 %v800_v24 }
  0xeb   : > { %v908_v25 = vpop.eup %907 }
  0xec   : > { %v910_v26 = vpop.eup %909  ;;  %v410_v27 = vadd.f32 1.0, %v908_v25 }
  0xed   : > { %v411_v28 = vadd.f32 1.0, %v910_v26  ;;  %v651_v26 = vld [vmem:[%s1009_s12 + $0x10] sm:$0xff] }
  0xee   : > { %911 = vrcp.f32 %v410_v27 }
  0xef   : > { %913 = vrcp.f32 %v411_v28 }
  0xf8   : > { %v912_v31 = vpop.eup %911 }
  0xf9   : > { %v914_v35 = vpop.eup %913  ;;  %v427_v36 = vrot.slane %v912_v31, %v321_v14 }
  0xfa   : > { %v431_v40 = vrot.slane %v914_v35, %v321_v14  ;;  %v648_v14 = vand.u32 127, %v319_v12 }
  0xfb   : > { %v432_v41 = vmul.f32 %v427_v36, %v416_v29  ;;  %v434_v42 = vmul.f32 %v427_v36, %v418_v30  ;;  %v436_v43 = vmul.f32 %v427_v36, %v420_v32  ;;  %v438_v44 = vmul.f32 %v427_v36, %v422_v33  ;;  %v652_v29 = vld [vmem:[%s1009_s12 + $0x18] sm:$0xff] }
  0xfc   : > { %v433_v45 = vmul.f32 %v431_v40, %v417_v34  ;;  %v435_v46 = vmul.f32 %v431_v40, %v419_v37  ;;  %v437_v47 = vmul.f32 %v431_v40, %v421_v38  ;;  %v439_v48 = vmul.f32 %v431_v40, %v423_v39 }
  0xfd   : > { %vm653_vm3 = vcmp.eq.s32.totalorder %v648_v14, 0 }
  0xfe   : > { %442 = vst.msk [vmem:[#allocation2 + $0x8] sm:$0xff] %vm441_vm2, %v433_v45  ;;  %444 = vst.msk [vmem:[#allocation2 + $0x18] sm:$0xff] %vm441_vm2, %v435_v46 }
  0xff   : > { %446 = vst.msk [vmem:[#allocation2 + $0x28] sm:$0xff] %vm441_vm2, %v437_v47  ;;  %448 = vst.msk [vmem:[#allocation2 + $0x38] sm:$0xff] %vm441_vm2, %v439_v48 }
 0x105   : > { %v450_v49 = vld [vmem:[#allocation2 + $0x8] sm:$0xff]  ;;  %v452_v50 = vld [vmem:[#allocation2 + $0x18] sm:$0xff] }
 0x106   : > { %801 = vmatprep.mubr.msk.f32.mxu0 %vm441_vm2, %v450_v49  ;;  %802 = vmatprep.mubr.msk.f32.mxu1 %vm441_vm2, %v452_v50  ;;  %v454_v51 = vld [vmem:[#allocation2 + $0x28] sm:$0xff]  ;;  %v456_v52 = vld [vmem:[#allocation2 + $0x38] sm:$0xff] }
 0x107   : > { %583 = vmatmul.mubr.f32.vlgmr.msra.gmra.mrb[2].mxu0 %v432_v41  ;;  %589 = vmatmul.mubr.f32.vlgmr.msra.gmra.mrb[0].mxu1 %v434_v42 }
 0x108   : > { %803 = vmatprep.mubr.msk.f32.mxu1 %vm441_vm2, %v454_v51 }
 0x10b   : > { %595 = vmatmul.mubr.f32.gmra.mrb[2].mxu1 %v436_v43 }
 0x10c   : > { %804 = vmatprep.mubr.msk.f32.mxu1 %vm441_vm2, %v456_v52 }
 0x10f   : > { %601 = vmatmul.mubr.f32.gmra.mrb[4].mxu1 %v438_v44 }
 0x1da   : > { %v584_v53 = vpop.f32.mrb[2].mxu0  ;;  %v590_v54 = vpop.f32.mrb[0].mxu1 }
 0x1db   : > { %607 = vst [vmem:[%s1112_s18] sm:$0xff] %v584_v53  ;;  %609 = vst [vmem:[%s1112_s18 + $0x10] sm:$0xff] %v590_v54  ;;  %v586_v55 = vpop.f32.mrb[3].mxu0  ;;  %v592_v56 = vpop.f32.mrb[1].mxu1  ;;  %v629_v57 = vmul.f32 %v590_v54, %v590_v54  ;;  %v627_v58 = vmul.f32 %v584_v53, %v584_v53 }
 0x1dc   : > { %608 = vst [vmem:[%s1112_s18 + $0x8] sm:$0xff] %v586_v55  ;;  %v628_v59 = vmul.f32 %v586_v55, %v586_v55  ;;  %610 = vst [vmem:[%s1112_s18 + $0x18] sm:$0xff] %v592_v56  ;;  %v615_v60 = vadd.f32 %v586_v55, %v584_v53  ;;  %v630_v61 = vmul.f32 %v592_v56, %v592_v56 }
 0x1dd   : > { %v618_v62 = vadd.f32 %v592_v56, %v590_v54 }
 0x1de   : > { %v596_v63 = vpop.f32.mrb[2].mxu1  ;;  %616 = vadd.xlane.f32.xlu0 %v615_v60  ;;  %v638_v0 = vadd.f32 %v630_v61, %v629_v57  ;;  %v635_v1 = vadd.f32 %v628_v59, %v627_v58 }
 0x1df   : > { %611 = vst [vmem:[%s1112_s18 + $0x20] sm:$0xff] %v596_v63  ;;  %v598_v2 = vpop.f32.mrb[3].mxu1  ;;  %v631_v3 = vmul.f32 %v596_v63, %v596_v63 }
 0x1e0   : > { %612 = vst [vmem:[%s1112_s18 + $0x28] sm:$0xff] %v598_v2  ;;  %639 = vadd.xlane.f32.xlu1 %v638_v0  ;;  %v621_v4 = vadd.f32 %v598_v2, %v596_v63  ;;  %v632_v5 = vmul.f32 %v598_v2, %v598_v2 }
 0x1e2   : > { %v602_v6 = vpop.f32.mrb[4].mxu1  ;;  %619 = vadd.xlane.f32.xlu0 %v618_v62  ;;  %v641_v7 = vadd.f32 %v632_v5, %v631_v3 }
 0x1e3   : > { %613 = vst [vmem:[%s1112_s18 + $0x30] sm:$0xff] %v602_v6  ;;  %v604_v8 = vpop.f32.mrb[5].mxu1  ;;  %v633_v9 = vmul.f32 %v602_v6, %v602_v6 }
 0x1e4   : > { %614 = vst [vmem:[%s1112_s18 + $0x38] sm:$0xff] %v604_v8  ;;  %v634_v10 = vmul.f32 %v604_v8, %v604_v8  ;;  %622 = vadd.xlane.f32.xlu1 %v621_v4  ;;  %v624_v11 = vadd.f32 %v604_v8, %v602_v6 }
 0x1e6   : > { %636 = vadd.xlane.f32.xlu0 %v635_v1  ;;  %v644_v13 = vadd.f32 %v634_v10, %v633_v9 }
 0x1e8   : > { %625 = vadd.xlane.f32.xlu1 %v624_v11 }
 0x1ea   : > { %642 = vadd.xlane.f32.xlu0 %v641_v7 }
 0x1ec   : > { %645 = vadd.xlane.f32.xlu1 %v644_v13 }
 0x26b   : > { %v617_v15 = vpop.xlane.xlu0 %616 }
 0x26d   : > { %v640_v16 = vpop.xlane.xlu1 %639 }
 0x26f   : > { %v620_v18 = vpop.xlane.xlu0 %619 }
 0x270   : > { %v655_v19 = vsel %vm653_vm3, %v620_v18, %v640_v16 }
 0x271   : > { %v659_v20 = vadd.f32 %v655_v19, %v650_v17  ;;  %v623_v21 = vpop.xlane.xlu1 %622 }
 0x273   : > { %664 = vst.msk [vmem:[%s1009_s12 + $0x8] sm:$0xff] %vm308_vm1, %v659_v20  ;;  %v637_v23 = vpop.xlane.xlu0 %636 }
 0x274   : > { %v654_v24 = vsel %vm653_vm3, %v617_v15, %v637_v23 }
 0x275   : > { %v658_v12 = vadd.f32 %v654_v24, %v649_v22  ;;  %v626_v25 = vpop.xlane.xlu1 %625 }
 0x277   : > { %663 = vst.msk [vmem:[%s1009_s12] sm:$0xff] %vm308_vm1, %v658_v12  ;;  %v643_v27 = vpop.xlane.xlu0 %642 }
 0x278   : > { %v656_v28 = vsel %vm653_vm3, %v623_v21, %v643_v27 }
 0x279   : > { %v660_v30 = vadd.f32 %v656_v28, %v651_v26  ;;  %v646_v31 = vpop.xlane.xlu1 %645 }
 0x27a   : > { %v657_v32 = vsel %vm653_vm3, %v626_v25, %v646_v31 }
 0x27b   : > { %665 = vst.msk [vmem:[%s1009_s12 + $0x10] sm:$0xff] %vm308_vm1, %v660_v30  ;;  %v661_v33 = vadd.f32 %v657_v32, %v652_v29 }
 0x27d   : > { %666 = vst.msk [vmem:[%s1009_s12 + $0x18] sm:$0xff] %vm308_vm1, %v661_v33 }
 0x27e PF: > { %s17_s23 = sadd.s32 1, %s937_s23   ;;  %s1155_s21 = smov %s933_s22 }
 0x27f   : > { %p14_p5 = scmp.ge.s32.totalorder %s17_s23, 4   ;;  %s1156_s22 = smov %s1158_s24 }
 0x281   :  { %16 = sbr.rel (!%p14_p5) target bundleno = 2 (0x2), region = 87 }

</bundles_post_ra>
